<compile_context>
chip_gen: v7x
topology: tpu7x:2x2x1
jax: 0.10.0
libtpu: 0.0.40
codegen_flags: <defaults>
</compile_context>

<pallas_src>
import functools

import jax
import jax.numpy as jnp
import numpy as np
from jax import lax
from jax.experimental import pallas as pl
from jax.experimental.pallas import tpu as pltpu

EPS = 1e-5
DEFAULT_TARGET_ROWS = 1024


def _vmem_limit_bytes():
    # ~80% of physical VMEM (51 MiB on v7x's 64 MiB, ~102 MiB on v5e/v6e's 128 MiB).
    try:
        cap = int(pltpu.get_tpu_info().vmem_capacity_bytes)
        return max(32 * 1024 * 1024, int(cap * 0.8))
    except Exception:
        return 48 * 1024 * 1024


_VMEM_LIMIT = _vmem_limit_bytes()


def _pick_row_tile(rows, target):
    """Largest multiple-of-8 divisor of `rows` <= target (prefer >=2 grid steps)."""
    cap = min(int(target), rows)
    if rows >= 16 and rows % 2 == 0:
        cap = min(cap, rows // 2)          # >=2 steps where possible (v7x megacore)
    cap = max(cap, 8)
    for t in range(min(cap, rows), 7, -1):
        if t % 8 == 0 and rows % t == 0:
            return t
    return rows                            # single block == full dims (always legal)


def _vmem_row_cap(k_in, c_out, in_bytes, out_bytes):
    per_row = 2 * (k_in * in_bytes + c_out * out_bytes) + 4 * c_out
    return max(8, (_VMEM_LIMIT // 3) // max(per_row, 1))


# ----------------------------------------------------------------------------
# Shared finalization: Chan/Welford merge of per-tile BN statistics (tiny).
# ----------------------------------------------------------------------------
def _finalize_bn(psum, pm2, tile_count, total_rows, gamma, beta):
    # psum, pm2: (T, 1, C) f32; tile_count rows per tile; total_rows overall.
    mean = jnp.sum(psum, axis=0) / total_rows                       # (1, C)
    mu_t = psum / tile_count                                        # (T, 1, C)
    m2 = jnp.sum(pm2, axis=0) + tile_count * jnp.sum((mu_t - mean) ** 2, axis=0)
    var = jnp.maximum(m2 / total_rows, 0.0)                         # biased (train mode)
    scale = gamma * lax.rsqrt(var + EPS)
    shift = beta - mean * scale
    return scale.astype(jnp.float32), shift.astype(jnp.float32)


# ----------------------------------------------------------------------------
# 1x1 conv as GEMM + partial BN stats, with the PREVIOUS stage's BN apply + ReLU
# optionally fused onto the loaded tile (used for conv1 and conv3).
# ----------------------------------------------------------------------------
def _mm_stats_kernel(*refs, prev_bn, prev_relu, inv_rows_tile):
    if prev_bn:
        x_ref, sc_ref, sh_ref, w_ref, y_ref, ps_ref, pq_ref = refs
    else:
        x_ref, w_ref, y_ref, ps_ref, pq_ref = refs
    x = x_ref[...].astype(jnp.float32)
    if prev_bn:
        x = x * sc_ref[...] + sh_ref[...]
        if prev_relu:
            x = jnp.maximum(x, 0.0)
    acc = jnp.dot(x.astype(w_ref.dtype), w_ref[...],
                  preferred_element_type=jnp.float32)
    y_ref[...] = acc.astype(y_ref.dtype)
    s = jnp.sum(acc, axis=0, keepdims=True)
    mu = s * inv_rows_tile
    d = acc - mu
    ps_ref[0] = s
    pq_ref[0] = jnp.sum(d * d, axis=0, keepdims=True)


def _mm_stats(x, w, *, scale=None, shift=None, prev_relu=True,
              y_dtype, target_rows):
    rows, kin = x.shape
    cout = w.shape[1]
    cap = min(target_rows,
              _vmem_row_cap(kin, cout, x.dtype.itemsize, jnp.dtype(y_dtype).itemsize))
    tile = _pick_row_tile(rows, cap)
    nsteps = rows // tile
    prev_bn = scale is not None

    kernel = functools.partial(_mm_stats_kernel, prev_bn=prev_bn,
                               prev_relu=prev_relu, inv_rows_tile=1.0 / tile)
    in_specs = [pl.BlockSpec((tile, kin), lambda i: (i, 0))]
    args = [x]
    if prev_bn:
        in_specs += [pl.BlockSpec((1, kin), lambda i: (0, 0)),
                     pl.BlockSpec((1, kin), lambda i: (0, 0))]
        args += [scale, shift]
    in_specs.append(pl.BlockSpec((kin, cout), lambda i: (0, 0)))   # resident weights
    args.append(w)

    y, ps, pq = pl.pallas_call(
        kernel,
        out_shape=(jax.ShapeDtypeStruct((rows, cout), y_dtype),
                   jax.ShapeDtypeStruct((nsteps, 1, cout), jnp.float32),
                   jax.ShapeDtypeStruct((nsteps, 1, cout), jnp.float32)),
        grid=(nsteps,),
        in_specs=in_specs,
        out_specs=(pl.BlockSpec((tile, cout), lambda i: (i, 0)),
                   pl.BlockSpec((1, 1, cout), lambda i: (i, 0, 0)),
                   pl.BlockSpec((1, 1, cout), lambda i: (i, 0, 0))),
        compiler_params=pltpu.CompilerParams(
            dimension_semantics=("parallel",),
            vmem_limit_bytes=_VMEM_LIMIT),
    )(*args)
    return y, ps, pq, float(tile)


# ----------------------------------------------------------------------------
# conv2: 3x3, pad=1, stride=1, with bn1-apply + ReLU fused on the loaded halo
# block.  In-VMEM im2col (no HBM patch matrix) + one folded-K GEMM + BN2 stats.
# ----------------------------------------------------------------------------
def _conv3x3_fused_kernel(xm_ref, ha_ref, hb_ref, sc_ref, sh_ref, w_ref,
                          y_ref, ps_ref, pq_ref, xbuf_ref, patch_ref,
                          *, bh, h_img, w_img, cin):
    hbi = pl.program_id(1)
    w_out = w_img                       # stride 1, pad 1, k 3
    wpad = w_img + 2
    rb = bh * w_out

    # ---- assemble the raw halo slab (buffer col c <-> original col c-1) ----
    xbuf_ref[0, 1:w_img + 1] = ha_ref[0, 0]               # row above the block
    xbuf_ref[1:bh + 1, 1:w_img + 1] = xm_ref[0]           # the block itself
    xbuf_ref[bh + 1, 1:w_img + 1] = hb_ref[0, 0]          # row below the block

    # ---- bn1 * scale + shift, ReLU, zero-padding mask (row by row) ----
    sc = sc_ref[...]
    sh = sh_ref[...]
    wc = lax.broadcasted_iota(jnp.int32, (wpad, 1), 0)
    w_ok = (wc >= 1) & (wc <= w_img)
    h0 = hbi * bh - 1                                       # orig row of buffer row 0

    def act_row(r, carry):
        oh = h0 + r
        v = xbuf_ref[r].astype(jnp.float32)
        a = jnp.maximum(v * sc + sh, 0.0)
        ok = w_ok & (oh >= 0) & (oh < h_img)
        xbuf_ref[r] = jnp.where(ok, a, 0.0).astype(xbuf_ref.dtype)
        return carry

    lax.fori_loop(0, bh + 2, act_row, 0)

    # ---- in-VMEM im2col: (rb, 9*cin) patch matrix, (ky, kx, ci) K-order ----
    def gather_row(r, carry):
        base = r * w_out
        for t in range(9):
            ky, kx = t // 3, t % 3
            v = xbuf_ref[r + ky, kx:kx + w_out, :]          # (W_out, Cin)
            patch_ref[pl.ds(base, w_out), t * cin:(t + 1) * cin] = v
        return carry

    lax.fori_loop(0, bh, gather_row, 0)

    # ---- single folded-K GEMM + partial BN2 stats ----
    acc = jnp.dot(patch_ref[...], w_ref[...], preferred_element_type=jnp.float32)
    y_ref[...] = acc.astype(y_ref.dtype)
    s = jnp.sum(acc, axis=0, keepdims=True)
    mu = s * (1.0 / rb)
    d = acc - mu
    ps_ref[0] = s
    pq_ref[0] = jnp.sum(d * d, axis=0, keepdims=True)


def _pick_bh(h, w_out, n_batch, target_rows):
    cap = max(1, min(h, int(target_rows) // max(w_out, 1)))
    if n_batch == 1 and h >= 2:
        cap = min(cap, max(1, h // 2))      # >=2 grid steps for megacore
    for b in range(cap, 0, -1):
        if h % b == 0 and (b * w_out) % 8 == 0:
            return b
    return None


def _conv3x3_bn_fused(x_raw_nhwc, w2_flat, scale_prev, shift_prev, *,
                      y_dtype, target_rows, mxu_dtype):
    n, h, w, cin = x_raw_nhwc.shape
    cout = w2_flat.shape[1]
    ms = jnp.dtype(mxu_dtype).itemsize
    per_row = 9 * cin * ms + 2 * cout * jnp.dtype(y_dtype).itemsize + 4 * cout + 3 * cin * ms
    row_cap = max(8, (_VMEM_LIMIT // 3) // max(per_row, 1))
    bh = _pick_bh(h, w, n, min(target_rows, row_cap))
    if bh is None:
        return None
    nhb = h // bh
    rb = bh * w
    rows = n * h * w
    nsteps = n * nhb

    kernel = functools.partial(_conv3x3_fused_kernel, bh=bh, h_img=h,
                               w_img=w, cin=cin)
    y, ps, pq = pl.pallas_call(
        kernel,
        out_shape=(jax.ShapeDtypeStruct((rows, cout), y_dtype),
                   jax.ShapeDtypeStruct((nsteps, 1, cout), jnp.float32),
                   jax.ShapeDtypeStruct((nsteps, 1, cout), jnp.float32)),
        grid=(n, nhb),
        in_specs=[
            pl.BlockSpec((1, bh, w, cin), lambda i, j: (i, j, 0, 0)),
            pl.BlockSpec((1, 1, w, cin),
                         lambda i, j: (i, jnp.maximum(j * bh - 1, 0), 0, 0)),
            pl.BlockSpec((1, 1, w, cin),
                         lambda i, j: (i, jnp.minimum(j * bh + bh, h - 1), 0, 0)),
            pl.BlockSpec((1, cin), lambda i, j: (0, 0)),
            pl.BlockSpec((1, cin), lambda i, j: (0, 0)),
            pl.BlockSpec((9 * cin, cout), lambda i, j: (0, 0)),   # resident weights
        ],
        out_specs=(
            pl.BlockSpec((rb, cout), lambda i, j: (i * nhb + j, 0)),
            pl.BlockSpec((1, 1, cout), lambda i, j: (i * nhb + j, 0, 0)),
            pl.BlockSpec((1, 1, cout), lambda i, j: (i * nhb + j, 0, 0)),
        ),
        scratch_shapes=[
            pltpu.VMEM((bh + 2, w + 2, cin), mxu_dtype),          # halo slab
            pltpu.VMEM((rb, 9 * cin), mxu_dtype),                 # patch matrix
        ],
        compiler_params=pltpu.CompilerParams(
            dimension_semantics=("parallel", "parallel"),
            vmem_limit_bytes=_VMEM_LIMIT),
    )(x_raw_nhwc, x_raw_nhwc, x_raw_nhwc, scale_prev, shift_prev, w2_flat)
    return y, ps, pq, float(rb)


# ----------------------------------------------------------------------------
# Standalone y*scale + shift (+ReLU): used for the final bn3 and the stride>1
# fallback only.
# ----------------------------------------------------------------------------
def _scale_shift_kernel(y_ref, sc_ref, sh_ref, o_ref, *, relu):
    y = y_ref[...].astype(jnp.float32) * sc_ref[...] + sh_ref[...]
    if relu:
        y = jnp.maximum(y, 0.0)
    o_ref[...] = y.astype(o_ref.dtype)


def _scale_shift(y, scale, shift, *, relu, out_dtype, target_rows):
    rows, c = y.shape
    tile = _pick_row_tile(rows, target_rows)
    nsteps = rows // tile
    return pl.pallas_call(
        functools.partial(_scale_shift_kernel, relu=relu),
        out_shape=jax.ShapeDtypeStruct((rows, c), out_dtype),
        grid=(nsteps,),
        in_specs=[pl.BlockSpec((tile, c), lambda i: (i, 0)),
                  pl.BlockSpec((1, c), lambda i: (0, 0)),
                  pl.BlockSpec((1, c), lambda i: (0, 0))],
        out_specs=pl.BlockSpec((tile, c), lambda i: (i, 0)),
        compiler_params=pltpu.CompilerParams(
            dimension_semantics=("parallel",),
            vmem_limit_bytes=_VMEM_LIMIT),
    )(y, scale, shift)


# ----------------------------------------------------------------------------
# XLA im2col fallback (stride > 1, or when no valid row-block exists).
# ----------------------------------------------------------------------------
def _im2col_folded(xp, ho, wo, stride):
    n, _, _, c = xp.shape
    cols = []
    for ky in range(3):
        for kx in range(3):
            tap = lax.slice(
                xp, (0, ky, kx, 0),
                (n, ky + (ho - 1) * stride + 1, kx + (wo - 1) * stride + 1, c),
                (1, stride, stride, 1))
            cols.append(tap.reshape(n * ho * wo, c))
    return jnp.concatenate(cols, axis=-1)


# ----------------------------------------------------------------------------
# Bottleneck_noshortcut forward (NCHW in / NCHW out, like the PyTorch module).
# ----------------------------------------------------------------------------
def bottleneck_noshortcut(x_nchw, params, stride=1, *,
                          target_rows=DEFAULT_TARGET_ROWS,
                          mxu_dtype=jnp.bfloat16):
    # TODO(synk): fold the NCHW<->NHWC boundary transposes into the first/last kernels.
    x = jnp.transpose(x_nchw, (0, 2, 3, 1)).astype(jnp.float32)     # -> NHWC
    n, h, w, cin = x.shape
    planes = params["w1"].shape[1]
    cexp = params["w3"].shape[1]

    w1 = params["w1"].astype(mxu_dtype)                              # (Cin, planes)
    w2 = params["w2"].astype(mxu_dtype)                              # (3,3,planes,planes) HWIO
    w3 = params["w3"].astype(mxu_dtype)                              # (planes, 4*planes)
    w2f = w2.reshape(9 * planes, planes)

    # ---- conv1 (1x1) + partial bn1 stats (f32 input cast inside the kernel) ----
    rows1 = n * h * w
    y1, ps1, pq1, cnt1 = _mm_stats(x.reshape(rows1, cin), w1,
                                   y_dtype=mxu_dtype, target_rows=target_rows)
    sc1, sh1 = _finalize_bn(ps1, pq1, cnt1, float(rows1),
                            params["g1"], params["b1"])

    # ---- conv2 (3x3, stride, pad=1) with bn1+relu fused in, partial bn2 stats ----
    ho = (h + 2 - 3) // stride + 1
    wo = (w + 2 - 3) // stride + 1
    rows2 = n * ho * wo
    fused = None
    if stride == 1:
        try:
            fused = _conv3x3_bn_fused(y1.reshape(n, h, w, planes), w2f, sc1, sh1,
                                      y_dtype=mxu_dtype, target_rows=target_rows,
                                      mxu_dtype=mxu_dtype)
        except Exception:
            fused = None                 # safety net: fall back to the im2col path
    if fused is not None:
        y2, ps2, pq2, cnt2 = fused
    else:
        # TODO(synk): in-kernel strided halo path for stride>1; XLA im2col fallback.
        a1 = _scale_shift(y1, sc1, sh1, relu=True, out_dtype=mxu_dtype,
                          target_rows=target_rows)
        xp = jnp.pad(a1.reshape(n, h, w, planes),
                     ((0, 0), (1, 1), (1, 1), (0, 0)))
        patches = _im2col_folded(xp, ho, wo, stride)
        y2, ps2, pq2, cnt2 = _mm_stats(patches, w2f, y_dtype=mxu_dtype,
                                       target_rows=target_rows)
    sc2, sh2 = _finalize_bn(ps2, pq2, cnt2, float(rows2),
                            params["g2"], params["b2"])

    # ---- conv3 (1x1) with bn2+relu fused in, partial bn3 stats ----
    y3, ps3, pq3, cnt3 = _mm_stats(y2, w3, scale=sc2, shift=sh2, prev_relu=True,
                                   y_dtype=mxu_dtype, target_rows=target_rows)
    sc3, sh3 = _finalize_bn(ps3, pq3, cnt3, float(rows2),
                            params["g3"], params["b3"])

    # ---- bn3 apply (no relu); module boundary stays f32 ----
    out = _scale_shift(y3, sc3, sh3, relu=False, out_dtype=jnp.float32,
                       target_rows=target_rows)
    out = out.reshape(n, ho, wo, cexp)
    return jnp.transpose(out, (0, 3, 1, 2))                          # -> NCHW


# ----------------------------------------------------------------------------
# Pure-JAX reference (independent of the Pallas path) for correctness check.
# ----------------------------------------------------------------------------
def reference(x_nchw, params, stride=1, eps=EPS):
    x = jnp.transpose(x_nchw, (0, 2, 3, 1)).astype(jnp.float32)
    dn = ("NHWC", "HWIO", "NHWC")
    hp = lax.Precision.HIGHEST

    def bn(y, g, b):
        mean = jnp.mean(y, axis=(0, 1, 2), keepdims=True)
        var = jnp.mean((y - mean) ** 2, axis=(0, 1, 2), keepdims=True)
        return (y - mean) * (g * lax.rsqrt(var + eps)) + b

    y = lax.conv_general_dilated(x, params["w1"][None, None], (1, 1), "VALID",
                                 dimension_numbers=dn, precision=hp)
    y = jax.nn.relu(bn(y, params["g1"], params["b1"]))
    y = lax.conv_general_dilated(y, params["w2"], (stride, stride),
                                 ((1, 1), (1, 1)), dimension_numbers=dn,
                                 precision=hp)
    y = jax.nn.relu(bn(y, params["g2"], params["b2"]))
    y = lax.conv_general_dilated(y, params["w3"][None, None], (1, 1), "VALID",
                                 dimension_numbers=dn, precision=hp)
    y = bn(y, params["g3"], params["b3"])
    return jnp.transpose(y, (0, 3, 1, 2))


if __name__ == "__main__":
    # Small, deterministic setup: in_planes=4, planes=4, stride=1, x: (2,4,16,16)
    N, IN_PLANES, H, W = 2, 4, 16, 16
    PLANES, STRIDE, EXPANSION = 4, 1, 4

    keys = jax.random.split(jax.random.PRNGKey(0), 10)
    x = jax.random.normal(keys[0], (N, IN_PLANES, H, W), jnp.float32)

    params = {
        # conv weights channels-last: (Cin, Cout) for 1x1, HWIO for 3x3
        "w1": 0.3 * jax.random.normal(keys[1], (IN_PLANES, PLANES), jnp.float32),
        "g1": 1.0 + 0.1 * jax.random.normal(keys[2], (1, PLANES), jnp.float32),
        "b1": 0.1 * jax.random.normal(keys[3], (1, PLANES), jnp.float32),
        "w2": 0.2 * jax.random.normal(keys[4], (3, 3, PLANES, PLANES), jnp.float32),
        "g2": 1.0 + 0.1 * jax.random.normal(keys[5], (1, PLANES), jnp.float32),
        "b2": 0.1 * jax.random.normal(keys[6], (1, PLANES), jnp.float32),
        "w3": 0.3 * jax.random.normal(keys[7], (PLANES, EXPANSION * PLANES), jnp.float32),
        "g3": 1.0 + 0.1 * jax.random.normal(keys[8], (1, EXPANSION * PLANES), jnp.float32),
        "b3": 0.1 * jax.random.normal(keys[9], (1, EXPANSION * PLANES), jnp.float32),
    }

    ref = jax.block_until_ready(reference(x, params, stride=STRIDE))

    # Strict check: f32 MXU operands (same math as the PyTorch module).
    out_f32 = jax.block_until_ready(
        bottleneck_noshortcut(x, params, stride=STRIDE, mxu_dtype=jnp.float32))
    assert out_f32.shape == (N, EXPANSION * PLANES, H // STRIDE, W // STRIDE), out_f32.shape
    np.testing.assert_allclose(np.asarray(out_f32), np.asarray(ref),
                               atol=2e-3, rtol=2e-3)

    # Production path: bf16 MXU operands / bf16 intermediates, f32 accumulation
    # and f32 BN stat/epilogue math.
    out_bf16 = jax.block_until_ready(
        bottleneck_noshortcut(x, params, stride=STRIDE))
    assert out_bf16.shape == out_f32.shape, out_bf16.shape
    rel_l2 = (np.linalg.norm(np.asarray(out_bf16) - np.asarray(ref))
              / np.linalg.norm(np.asarray(ref)))
    assert rel_l2 < 5e-2, f"bf16 path relative L2 error too high: {rel_l2}"

    print("KERNEL_OK")
</pallas_src>

<mosaic_0001>
module attributes {stable_mosaic.version = 11 : i64} {
  func.func @_mm_stats_kernel(%arg0: i32, %arg1: memref<256x4xf32, #tpu.memory_space<vmem>>, %arg2: memref<4x4xf32, #tpu.memory_space<vmem>>, %arg3: memref<256x4xf32, #tpu.memory_space<vmem>>, %arg4: memref<1x1x4xf32, #tpu.memory_space<vmem>>, %arg5: memref<1x1x4xf32, #tpu.memory_space<vmem>>) attributes {dimension_semantics = [#tpu.dimension_semantics<parallel>], iteration_bounds = array<i64: 2>, scalar_prefetch = 0 : i64, scratch_operands = 0 : i64, tpu.core_type = #tpu.core_type<tc>, window_params = [{transform_indices = @transform_0, window_bounds = array<i64: 256, 4>}, {pipeline_mode = #tpu.pipeline_mode<synchronous>, transform_indices = @transform_1, window_bounds = array<i64: 4, 4>}, {transform_indices = @transform_2, window_bounds = array<i64: 256, 4>}, {transform_indices = @transform_3, window_bounds = array<i64: 1, 1, 4>}, {transform_indices = @transform_4, window_bounds = array<i64: 1, 1, 4>}]} {
    %c0 = arith.constant 0 : index
    %c0_0 = arith.constant 0 : index
    %0 = vector.load %arg1[%c0, %c0_0] : memref<256x4xf32, #tpu.memory_space<vmem>>, vector<256x4xf32>
    %c0_1 = arith.constant 0 : index
    %c0_2 = arith.constant 0 : index
    %1 = vector.load %arg2[%c0_1, %c0_2] : memref<4x4xf32, #tpu.memory_space<vmem>>, vector<4x4xf32>
    %cst = arith.constant dense<0.000000e+00> : vector<256x4xf32>
    %2 = tpu.matmul %0, %1, %cst {dimension_numbers = #tpu.dot_dimension_numbers<[1], [0], [0], [1], [0, 0, 1, 1], [], []>} : vector<256x4xf32>, vector<4x4xf32>, vector<256x4xf32> -> vector<256x4xf32>
    %c0_3 = arith.constant 0 : index
    %c0_4 = arith.constant 0 : index
    %3 = vector.load %arg3[%c0_3, %c0_4] : memref<256x4xf32, #tpu.memory_space<vmem>>, vector<256x4xf32>
    tpu.vector_store %arg3[%c0_3, %c0_4], %2 {strides = array<i32>} : memref<256x4xf32, #tpu.memory_space<vmem>>, vector<256x4xf32>,
    %cst_5 = arith.constant dense<0.000000e+00> : vector<4xf32>
    %4 = vector.multi_reduction <add>, %2, %cst_5 [0] : vector<256x4xf32> to vector<4xf32>
    %5 = vector.shape_cast %4 : vector<4xf32> to vector<1x4xf32>
    %cst_6 = arith.constant 3.906250e-03 : f32
    %6 = vector.broadcast %cst_6 : f32 to vector<1x4xf32>
    %7 = arith.mulf %5, %6 : vector<1x4xf32>
    %8 = vector.broadcast %7 : vector<1x4xf32> to vector<256x4xf32>
    %9 = arith.subf %2, %8 : vector<256x4xf32>
    %c0_7 = arith.constant 0 : index
    %c0_8 = arith.constant 0 : index
    %c0_9 = arith.constant 0 : index
    %10 = vector.load %arg4[%c0_7, %c0_8, %c0_9] : memref<1x1x4xf32, #tpu.memory_space<vmem>>, vector<1x1x4xf32>
    %11 = vector.shape_cast %10 : vector<1x1x4xf32> to vector<1x4xf32>
    %12 = vector.shape_cast %5 : vector<1x4xf32> to vector<1x1x4xf32>
    tpu.vector_store %arg4[%c0_7, %c0_8, %c0_9], %12 {strides = array<i32>} : memref<1x1x4xf32, #tpu.memory_space<vmem>>, vector<1x1x4xf32>,
    %13 = arith.mulf %9, %9 : vector<256x4xf32>
    %cst_10 = arith.constant dense<0.000000e+00> : vector<4xf32>
    %14 = vector.multi_reduction <add>, %13, %cst_10 [0] : vector<256x4xf32> to vector<4xf32>
    %15 = vector.shape_cast %14 : vector<4xf32> to vector<1x4xf32>
    %c0_11 = arith.constant 0 : index
    %c0_12 = arith.constant 0 : index
    %c0_13 = arith.constant 0 : index
    %16 = vector.load %arg5[%c0_11, %c0_12, %c0_13] : memref<1x1x4xf32, #tpu.memory_space<vmem>>, vector<1x1x4xf32>
    %17 = vector.shape_cast %16 : vector<1x1x4xf32> to vector<1x4xf32>
    %18 = vector.shape_cast %15 : vector<1x4xf32> to vector<1x1x4xf32>
    tpu.vector_store %arg5[%c0_11, %c0_12, %c0_13], %18 {strides = array<i32>} : memref<1x1x4xf32, #tpu.memory_space<vmem>>, vector<1x1x4xf32>,
    return
  }
  func.func @transform_0(%arg0: i32) -> (i32, i32) {
    %c0_i32 = arith.constant 0 : i32
    %c0_i32_0 = arith.constant 0 : i32
    return %arg0, %c0_i32 : i32, i32
  }
  func.func @transform_1(%arg0: i32) -> (i32, i32) {
    %c0_i32 = arith.constant 0 : i32
    %c0_i32_0 = arith.constant 0 : i32
    %c0_i32_1 = arith.constant 0 : i32
    return %c0_i32, %c0_i32_0 : i32, i32
  }
  func.func @transform_2(%arg0: i32) -> (i32, i32) {
    %c0_i32 = arith.constant 0 : i32
    %c0_i32_0 = arith.constant 0 : i32
    return %arg0, %c0_i32 : i32, i32
  }
  func.func @transform_3(%arg0: i32) -> (i32, i32, i32) {
    %c0_i32 = arith.constant 0 : i32
    %c0_i32_0 = arith.constant 0 : i32
    %c0_i32_1 = arith.constant 0 : i32
    return %arg0, %c0_i32, %c0_i32_0 : i32, i32, i32
  }
  func.func @transform_4(%arg0: i32) -> (i32, i32, i32) {
    %c0_i32 = arith.constant 0 : i32
    %c0_i32_0 = arith.constant 0 : i32
    %c0_i32_1 = arith.constant 0 : i32
    return %arg0, %c0_i32, %c0_i32_0 : i32, i32, i32
  }
}

</mosaic_0001>

<bundles_post_ra>
// kernel: tpu_custom_call.1
= control target key start
LH: loop header
LB: loop body
LE: loop exit
PB: predicated region body
PF: predicated region fallthrough
CT: control target
= control target key end

     0   :  { %10 = vsyncpa [#allocation3], 0  ;;  %s1825_s0 = inlined_call_operand.vmem [shape: f32[512,4], index: 0, kind: input, shape index: {}]   ;;  %s1826_s1 = inlined_call_operand.vmem [shape: f32[4,4], index: 1, kind: input, shape index: {}]   ;;  %s1827_s2 = inlined_call_operand.vmem [shape: f32[512,4], index: 2, kind: output, shape index: {0}]   ;;  %s1828_s3 = inlined_call_operand.hbm [shape: f32[2,1,4], index: 3, kind: output, shape index: {1}]   ;;  %s1829_s4 = inlined_call_operand.hbm [shape: f32[2,1,4], index: 4, kind: output, shape index: {2}]  }
   0x1   :  { %12 = vsyncpa [#allocation3 + $0x1], 0 }
   0x2   :  { %13 = vsyncpa [#allocation5], 0 }
   0x3   :  { %15 = vsyncpa [#allocation5 + $0x1], 0  ;;  %s1261_s15 = smov 0   ;;  %s1263_s16 = smov 0  }
   0x4   :  { %s1265_s17 = smov 0   ;;  %s1267_s18 = smov 0  }
   0x5 LB: > { %s1282_s19 = sadd.s32 4294967295, %s1232_s18   ;;  %s964_s20 = sadd.s32 4294967294, %s1232_s18   ;;  %s1232_s18 = sphi %s1267_s18, %s1835_s18   ;;  %s1228_s17 = sphi %s1265_s17, %s1834_s17   ;;  %s1224_s16 = sphi %s1263_s16, %s1833_s16   ;;  %s1220_s15 = sphi %s1261_s15, %s1832_s15  }
   0x6   : > { %s1286_s21 = sadd.s32 1, %s1232_s18   ;;  %s101_s22 = sadd.s32 1, %s1228_s17 }
   0x7   : > { %s98_s23 = ssub.s32 %s1232_s18, %s1286_s21  ;;  %p111_p0 = scmp.ne.s32.totalorder %s1228_s17, %s1224_s16 }
   0x8   : > { %p99_p1 = scmp.eq.s32.totalorder %s98_s23, 0  ;;  %p112_p2 = scmp.eq.s32.totalorder %s1282_s19, 1 }
   0x9   : > { %p117_p3 = scmp.ne.s32.totalorder %s1224_s16, %s1220_s15  ;;  %p118_p4 = scmp.eq.s32.totalorder %s964_s20, 1 }
   0xa   : > { %s1297_s24 = scalar_select %p99_p1, %s1228_s17, %s101_s22  }
   0xb   : > { %p1299_p5 = por %p112_p2, %p111_p0  ;;  %p1303_p6 = por %p118_p4, %p117_p3 }
   0xc   : > { %p967_p7 = scmp.ge.s32.totalorder %s1232_s18, 1  ;;  %p174_p8 = scmp.lt.s32.totalorder %s1232_s18, 3 }
   0xe   : > { %p175_p9 = pnand %p967_p7, %p174_p8 }
   0xf   : > { %v252_v0 = vld [vmem:[%s1826_s1] sm:$0xf] (!%p175_p9)  ;;  %vm350_vm0 = vcmask (!%p175_p9), 1043456   ;;  %s968_s29 = sshll.u32 (!%p175_p9), %s1282_s19, 5  ;;  %vm253_vm1 = vcmask (!%p175_p9), 31744   ;;  %s1619_s11 = sand.u32 (!%p175_p9), 1, %s1224_s16  }
  0x10   : > { %178 = sbr.rel (%p175_p9) target bundleno = 430 (0x1ae), region = 28  ;;  %1042 = vmatprep.subr.msk.mxu0 (!%p175_p9), %vm350_vm0, %v252_v0  ;;  %p209_p10 = scmp.lt.s32.totalorder (!%p175_p9), %s968_s29, 63  ;;  %1092 = vmatprep.subr.msk.mxu1 (!%p175_p9), %vm350_vm0, %v252_v0  ;;  %vm713_vm2 = vcmask (!%p175_p9), 24576  }
  0x11   : > { %1043 = vmatpush3.msk.msra.mxu0 (!%p175_p9), %vm350_vm0, %v252_v0  ;;  %1093 = vmatpush3.msk.msra.mxu1 (!%p175_p9), %vm350_vm0, %v252_v0  ;;  %s1005_s12 = sshll.u32 (!%p175_p9), %s1282_s19, 4  ;;  %s201_s13 = scalar_lea.vmem (!%p175_p9), [#allocation2], %s1619_s11 }
  0x12   : > { %s843_s14 = sshll.u32 (!%p175_p9), %s201_s13, 4  ;;  %s1628_s23 = scalar_lea.hbm (!%p175_p9), %s1828_s3, %s1005_s12  ;;  %s1630_s14 = int_to_ptr.vmem [resolvable:$true] %s843_s14 }
  0x13   : > { %s823_s27 = scalar_lea.sflag (!%p175_p9), [#allocation3], %s1619_s11  ;;  %s1138_s28 = scalar_lea.vmem (!%p175_p9), %s1630_s14, 16 }
  0x14   : > { %p1139_p11 = scmp.ne.s32.totalorder (!%p175_p9), %s1630_s14, %s1138_s28 }
  0x16   : > { %p1140_p12 = pnand (!%p175_p9), %p1139_p11, %p1299_p5 }
  0x17   : > { %s1837_s29 = smov (!%p209_p10, %s968_s29), 63 }
  0x18   : > { %s969_s30 = sshll.u32 %s1837_s29, 3  ;;  %p1141_p13 = pneg %p1140_p12 }
  0x19   : > { %s1321_s7 = scalar_lea.vmem %s1825_s0, %s969_s30  ;;  %s1392_s10 = scalar_lea.vmem %s1827_s2, %s969_s30 }
  0x1a   : > { %v220_v1 = vld [vmem:[%s1321_s7] sm:$0xff]  ;;  %v221_v2 = vld [vmem:[%s1321_s7 + $0x8] sm:$0xff]  ;;  %v222_v3 = vld [vmem:[%s1321_s7 + $0x10] sm:$0xff]  ;;  %s1234_s29 = smov [#allocation2]  }
  0x1b   : > { %1044 = vmatprep.mubr.msk.f32.mxu0 %vm253_vm1, %v220_v1  ;;  %v223_v4 = vld [vmem:[%s1321_s7 + $0x18] sm:$0xff]  ;;  %v224_v5 = vld [vmem:[%s1321_s7 + $0x20] sm:$0xff]  ;;  %v237_v7 = vld [vmem:[%s1321_s7 + $0x88] sm:$0xff]  ;;  %s1142_s30 = sshll.u32 %s1234_s29, 4  ;;  %s1143_s30 = int_to_ptr.vmem [resolvable:$false] %s1142_s30 }
  0x1c   : > { %1045 = vmatmul.mubr.msk.f32.vlgmr.msra.gmra.mrb[0].mxu0 %vm253_vm1, %v221_v2  ;;  %v236_v6 = vld [vmem:[%s1321_s7 + $0x80] sm:$0xff]  ;;  %v238_v8 = vld [vmem:[%s1321_s7 + $0x90] sm:$0xff]  ;;  %v225_v9 = vld [vmem:[%s1321_s7 + $0x28] sm:$0xff]  ;;  %s1144_s5 = scalar_lea.vmem %s1143_s30, 32  ;;  %p1145_p0 = scmp.lt.s32.totalorder %s1630_s14, %s1143_s30 }
  0x1d   : > { %1047 = vmatprep.mubr.msk.f32.mxu0 %vm253_vm1, %v222_v3  ;;  %1068 = vmatprep.mubr.msk.f32.mxu1 %vm253_vm1, %v236_v6  ;;  %v226_v10 = vld [vmem:[%s1321_s7 + $0x30] sm:$0xff]  ;;  %v239_v11 = vld [vmem:[%s1321_s7 + $0x98] sm:$0xff]  ;;  %v240_v12 = vld [vmem:[%s1321_s7 + $0xa0] sm:$0xff]  ;;  %p1146_p1 = scmp.lt.s32.totalorder %s1144_s5, %s1138_s28 }
  0x1e   : > { %1069 = vmatmul.mubr.msk.f32.vlgmr.msra.gmra.mrb[0].mxu1 %vm253_vm1, %v237_v7  ;;  %v227_v13 = vld [vmem:[%s1321_s7 + $0x38] sm:$0xff]  ;;  %v228_v14 = vld [vmem:[%s1321_s7 + $0x40] sm:$0xff]  ;;  %v241_v15 = vld [vmem:[%s1321_s7 + $0xa8] sm:$0xff] }
  0x1f   : > { %1071 = vmatprep.mubr.msk.f32.mxu1 %vm253_vm1, %v238_v8  ;;  %v242_v16 = vld [vmem:[%s1321_s7 + $0xb0] sm:$0xff]  ;;  %v229_v17 = vld [vmem:[%s1321_s7 + $0x48] sm:$0xff]  ;;  %v243_v19 = vld [vmem:[%s1321_s7 + $0xb8] sm:$0xff]  ;;  %p1147_p2 = por %p1146_p1, %p1145_p0 }
  0x20   : > { %1048 = vmatmul.mubr.msk.f32.gmra.mrb[2].mxu0 %vm253_vm1, %v223_v4  ;;  %v230_v18 = vld [vmem:[%s1321_s7 + $0x50] sm:$0xff]  ;;  %v244_v20 = vld [vmem:[%s1321_s7 + $0xc0] sm:$0xff]  ;;  %v231_v21 = vld [vmem:[%s1321_s7 + $0x58] sm:$0xff] }
  0x21   : > { %1050 = vmatprep.mubr.msk.f32.mxu0 %vm253_vm1, %v224_v5  ;;  %v232_v22 = vld [vmem:[%s1321_s7 + $0x60] sm:$0xff]  ;;  %v245_v23 = vld [vmem:[%s1321_s7 + $0xc8] sm:$0xff]  ;;  %v246_v24 = vld [vmem:[%s1321_s7 + $0xd0] sm:$0xff]  ;;  %p1148_p3 = pnand %p1147_p2, %p1141_p13 }
  0x22   : > { %1072 = vmatmul.mubr.msk.f32.gmra.mrb[2].mxu1 %vm253_vm1, %v239_v11  ;;  %v233_v25 = vld [vmem:[%s1321_s7 + $0x68] sm:$0xff]  ;;  %v234_v26 = vld [vmem:[%s1321_s7 + $0x70] sm:$0xff]  ;;  %v247_v27 = vld [vmem:[%s1321_s7 + $0xd8] sm:$0xff] }
  0x23   : > { %1074 = vmatprep.mubr.msk.f32.mxu1 %vm253_vm1, %v240_v12  ;;  %v248_v28 = vld [vmem:[%s1321_s7 + $0xe0] sm:$0xff]  ;;  %v235_v29 = vld [vmem:[%s1321_s7 + $0x78] sm:$0xff]  ;;  %v249_v30 = vld [vmem:[%s1321_s7 + $0xe8] sm:$0xff] }
  0x24   : > { %1051 = vmatmul.mubr.msk.f32.gmra.mrb[4].mxu0 %vm253_vm1, %v225_v9  ;;  %v250_v31 = vld [vmem:[%s1321_s7 + $0xf0] sm:$0xff]  ;;  %v251_v32 = vld [vmem:[%s1321_s7 + $0xf8] sm:$0xff] }
  0x25   : > { %1053 = vmatprep.mubr.msk.f32.mxu0 %vm253_vm1, %v226_v10 }
  0x26   : > { %1075 = vmatmul.mubr.msk.f32.gmra.mrb[4].mxu1 %vm253_vm1, %v241_v15 }
  0x27   : > { %1077 = vmatprep.mubr.msk.f32.mxu1 %vm253_vm1, %v242_v16 }
  0x28   : > { %1054 = vmatmul.mubr.msk.f32.gmra.mrb[6].mxu0 %vm253_vm1, %v227_v13 }
  0x29   : > { %1056 = vmatprep.mubr.msk.f32.mxu0 %vm253_vm1, %v228_v14 }
  0x2a   : > { %1078 = vmatmul.mubr.msk.f32.gmra.mrb[6].mxu1 %vm253_vm1, %v243_v19 }
  0x2b   : > { %1080 = vmatprep.mubr.msk.f32.mxu1 %vm253_vm1, %v244_v20 }
  0x2c   : > { %1057 = vmatmul.mubr.msk.f32.gmra.mrb[8].mxu0 %vm253_vm1, %v229_v17 }
  0x2d   : > { %1059 = vmatprep.mubr.msk.f32.mxu0 %vm253_vm1, %v230_v18 }
  0x2e   : > { %1081 = vmatmul.mubr.msk.f32.gmra.mrb[8].mxu1 %vm253_vm1, %v245_v23 }
  0x2f   : > { %1083 = vmatprep.mubr.msk.f32.mxu1 %vm253_vm1, %v246_v24 }
  0x30   : > { %1060 = vmatmul.mubr.msk.f32.gmra.mrb[10].mxu0 %vm253_vm1, %v231_v21 }
  0x31   : > { %1062 = vmatprep.mubr.msk.f32.mxu0 %vm253_vm1, %v232_v22 }
  0x32   : > { %1084 = vmatmul.mubr.msk.f32.gmra.mrb[10].mxu1 %vm253_vm1, %v247_v27 }
  0x33   : > { %1086 = vmatprep.mubr.msk.f32.mxu1 %vm253_vm1, %v248_v28 }
  0x34   : > { %1063 = vmatmul.mubr.msk.f32.gmra.mrb[12].mxu0 %vm253_vm1, %v233_v25 }
  0x35   : > { %1065 = vmatprep.mubr.msk.f32.mxu0 %vm253_vm1, %v234_v26 }
  0x36   : > { %1087 = vmatmul.mubr.msk.f32.gmra.mrb[12].mxu1 %vm253_vm1, %v249_v30 }
  0x37   : > { %1089 = vmatprep.mubr.msk.f32.mxu1 %vm253_vm1, %v250_v31 }
  0x38   : > { %1066 = vmatmul.mubr.msk.f32.gmra.mrb[14].mxu0 %vm253_vm1, %v235_v29 }
  0x3a   : > { %1090 = vmatmul.mubr.msk.f32.gmra.mrb[14].mxu1 %vm253_vm1, %v251_v32 }
  0xef   : > { %v1394_v33 = vpop.f32.mrb[0].mxu0 }
  0xf0   : > { %580 = vst.msk [vmem:[%s1392_s10 + $0x8] sm:$0xff] %vm253_vm1, %v1394_v33  ;;  %v612_v34 = vsel %vm253_vm1, %v1394_v33, 0.0  ;;  %v1401_v35 = vpop.f32.mrb[1].mxu0 }
  0xf1   : > { %579 = vst.msk [vmem:[%s1392_s10] sm:$0xff] %vm253_vm1, %v1401_v35  ;;  %v611_v36 = vsel %vm253_vm1, %v1401_v35, 0.0  ;;  %v1415_v40 = vpop.f32.mrb[0].mxu1 }
  0xf2   : > { %v613_v37 = vadd.f32 %v612_v34, %v611_v36  ;;  %596 = vst.msk [vmem:[%s1392_s10 + $0x88] sm:$0xff] %vm253_vm1, %v1415_v40  ;;  %v1425_v42 = vpop.f32.mrb[1].mxu1  ;;  %v644_v36 = vsel %vm253_vm1, %v1415_v40, 0.0 }
  0xf3   : > { %v1408_v38 = vpop.f32.mrb[2].mxu0  ;;  %595 = vst.msk [vmem:[%s1392_s10 + $0x80] sm:$0xff] %vm253_vm1, %v1425_v42  ;;  %v642_v29 = vsel %vm253_vm1, %v1425_v42, 0.0 }
  0xf4   : > { %582 = vst.msk [vmem:[%s1392_s10 + $0x18] sm:$0xff] %vm253_vm1, %v1408_v38  ;;  %v1413_v39 = vpop.f32.mrb[3].mxu0  ;;  %v616_v44 = vsel %vm253_vm1, %v1408_v38, 0.0 }
  0xf5   : > { %581 = vst.msk [vmem:[%s1392_s10 + $0x10] sm:$0xff] %vm253_vm1, %v1413_v39  ;;  %v614_v41 = vsel %vm253_vm1, %v1413_v39, 0.0  ;;  %v1439_v48 = vpop.f32.mrb[2].mxu1 }
  0xf6   : > { %v615_v43 = vadd.f32 %v614_v41, %v613_v37  ;;  %598 = vst.msk [vmem:[%s1392_s10 + $0x98] sm:$0xff] %vm253_vm1, %v1439_v48  ;;  %v1449_v50 = vpop.f32.mrb[3].mxu1 }
  0xf7   : > { %v1432_v45 = vpop.f32.mrb[4].mxu0  ;;  %597 = vst.msk [vmem:[%s1392_s10 + $0x90] sm:$0xff] %vm253_vm1, %v1449_v50  ;;  %v646_v37 = vsel %vm253_vm1, %v1449_v50, 0.0 }
  0xf8   : > { %584 = vst.msk [vmem:[%s1392_s10 + $0x28] sm:$0xff] %vm253_vm1, %v1432_v45  ;;  %v1437_v46 = vpop.f32.mrb[5].mxu0  ;;  %v617_v47 = vadd.f32 %v616_v44, %v615_v43  ;;  %v620_v52 = vsel %vm253_vm1, %v1432_v45, 0.0  ;;  %v648_v44 = vsel %vm253_vm1, %v1439_v48, 0.0 }
  0xf9   : > { %583 = vst.msk [vmem:[%s1392_s10 + $0x20] sm:$0xff] %vm253_vm1, %v1437_v46  ;;  %v618_v49 = vsel %vm253_vm1, %v1437_v46, 0.0  ;;  %v1463_v56 = vpop.f32.mrb[4].mxu1 }
  0xfa   : > { %v619_v51 = vadd.f32 %v618_v49, %v617_v47  ;;  %600 = vst.msk [vmem:[%s1392_s10 + $0xa8] sm:$0xff] %vm253_vm1, %v1463_v56  ;;  %v1473_v58 = vpop.f32.mrb[5].mxu1 }
  0xfb   : > { %v1456_v53 = vpop.f32.mrb[6].mxu0  ;;  %599 = vst.msk [vmem:[%s1392_s10 + $0xa0] sm:$0xff] %vm253_vm1, %v1473_v58  ;;  %v650_v47 = vsel %vm253_vm1, %v1473_v58, 0.0 }
  0xfc   : > { %586 = vst.msk [vmem:[%s1392_s10 + $0x38] sm:$0xff] %vm253_vm1, %v1456_v53  ;;  %v1461_v54 = vpop.f32.mrb[7].mxu0  ;;  %v621_v55 = vadd.f32 %v620_v52, %v619_v51  ;;  %v624_v60 = vsel %vm253_vm1, %v1456_v53, 0.0  ;;  %v652_v52 = vsel %vm253_vm1, %v1463_v56, 0.0 }
  0xfd   : > { %585 = vst.msk [vmem:[%s1392_s10 + $0x30] sm:$0xff] %vm253_vm1, %v1461_v54  ;;  %v622_v57 = vsel %vm253_vm1, %v1461_v54, 0.0  ;;  %v1487_v0 = vpop.f32.mrb[6].mxu1 }
  0xfe   : > { %v623_v59 = vadd.f32 %v622_v57, %v621_v55  ;;  %602 = vst.msk [vmem:[%s1392_s10 + $0xb8] sm:$0xff] %vm253_vm1, %v1487_v0  ;;  %v1497_v2 = vpop.f32.mrb[7].mxu1 }
  0xff   : > { %v1480_v61 = vpop.f32.mrb[8].mxu0  ;;  %601 = vst.msk [vmem:[%s1392_s10 + $0xb0] sm:$0xff] %vm253_vm1, %v1497_v2  ;;  %v654_v55 = vsel %vm253_vm1, %v1497_v2, 0.0 }
 0x100   : > { %588 = vst.msk [vmem:[%s1392_s10 + $0x48] sm:$0xff] %vm253_vm1, %v1480_v61  ;;  %v1485_v62 = vpop.f32.mrb[9].mxu0  ;;  %v625_v63 = vadd.f32 %v624_v60, %v623_v59  ;;  %v628_v4 = vsel %vm253_vm1, %v1480_v61, 0.0  ;;  %v656_v60 = vsel %vm253_vm1, %v1487_v0, 0.0 }
 0x101   : > { %587 = vst.msk [vmem:[%s1392_s10 + $0x40] sm:$0xff] %vm253_vm1, %v1485_v62  ;;  %v626_v1 = vsel %vm253_vm1, %v1485_v62, 0.0  ;;  %v1511_v8 = vpop.f32.mrb[8].mxu1 }
 0x102   : > { %v627_v3 = vadd.f32 %v626_v1, %v625_v63  ;;  %604 = vst.msk [vmem:[%s1392_s10 + $0xc8] sm:$0xff] %vm253_vm1, %v1511_v8  ;;  %v1521_v10 = vpop.f32.mrb[9].mxu1 }
 0x103   : > { %v1504_v5 = vpop.f32.mrb[10].mxu0  ;;  %603 = vst.msk [vmem:[%s1392_s10 + $0xc0] sm:$0xff] %vm253_vm1, %v1521_v10  ;;  %v658_v63 = vsel %vm253_vm1, %v1521_v10, 0.0 }
 0x104   : > { %590 = vst.msk [vmem:[%s1392_s10 + $0x58] sm:$0xff] %vm253_vm1, %v1504_v5  ;;  %v1509_v6 = vpop.f32.mrb[11].mxu0  ;;  %v629_v7 = vadd.f32 %v628_v4, %v627_v3  ;;  %v632_v12 = vsel %vm253_vm1, %v1504_v5, 0.0  ;;  %v660_v4 = vsel %vm253_vm1, %v1511_v8, 0.0 }
 0x105   : > { %589 = vst.msk [vmem:[%s1392_s10 + $0x50] sm:$0xff] %vm253_vm1, %v1509_v6  ;;  %v630_v9 = vsel %vm253_vm1, %v1509_v6, 0.0  ;;  %v1535_v16 = vpop.f32.mrb[10].mxu1 }
 0x106   : > { %v631_v11 = vadd.f32 %v630_v9, %v629_v7  ;;  %606 = vst.msk [vmem:[%s1392_s10 + $0xd8] sm:$0xff] %vm253_vm1, %v1535_v16  ;;  %v1545_v18 = vpop.f32.mrb[11].mxu1 }
 0x107   : > { %v1528_v13 = vpop.f32.mrb[12].mxu0  ;;  %605 = vst.msk [vmem:[%s1392_s10 + $0xd0] sm:$0xff] %vm253_vm1, %v1545_v18  ;;  %v662_v7 = vsel %vm253_vm1, %v1545_v18, 0.0 }
 0x108   : > { %592 = vst.msk [vmem:[%s1392_s10 + $0x68] sm:$0xff] %vm253_vm1, %v1528_v13  ;;  %v1533_v14 = vpop.f32.mrb[13].mxu0  ;;  %v633_v15 = vadd.f32 %v632_v12, %v631_v11  ;;  %v636_v20 = vsel %vm253_vm1, %v1528_v13, 0.0  ;;  %v664_v12 = vsel %vm253_vm1, %v1535_v16, 0.0 }
 0x109   : > { %591 = vst.msk [vmem:[%s1392_s10 + $0x60] sm:$0xff] %vm253_vm1, %v1533_v14  ;;  %v634_v17 = vsel %vm253_vm1, %v1533_v14, 0.0  ;;  %v1559_v24 = vpop.f32.mrb[12].mxu1 }
 0x10a   : > { %v635_v19 = vadd.f32 %v634_v17, %v633_v15  ;;  %608 = vst.msk [vmem:[%s1392_s10 + $0xe8] sm:$0xff] %vm253_vm1, %v1559_v24  ;;  %v1569_v26 = vpop.f32.mrb[13].mxu1 }
 0x10b   : > { %v1552_v21 = vpop.f32.mrb[14].mxu0  ;;  %607 = vst.msk [vmem:[%s1392_s10 + $0xe0] sm:$0xff] %vm253_vm1, %v1569_v26  ;;  %v666_v15 = vsel %vm253_vm1, %v1569_v26, 0.0 }
 0x10c   : > { %594 = vst.msk [vmem:[%s1392_s10 + $0x78] sm:$0xff] %vm253_vm1, %v1552_v21  ;;  %v1557_v22 = vpop.f32.mrb[15].mxu0  ;;  %v637_v23 = vadd.f32 %v636_v20, %v635_v19  ;;  %v640_v28 = vsel %vm253_vm1, %v1552_v21, 0.0  ;;  %v668_v20 = vsel %vm253_vm1, %v1559_v24, 0.0 }
 0x10d   : > { %593 = vst.msk [vmem:[%s1392_s10 + $0x70] sm:$0xff] %vm253_vm1, %v1557_v22  ;;  %v638_v25 = vsel %vm253_vm1, %v1557_v22, 0.0  ;;  %v1578_v31 = vpop.f32.mrb[14].mxu1 }
 0x10e   : > { %v639_v27 = vadd.f32 %v638_v25, %v637_v23  ;;  %610 = vst.msk [vmem:[%s1392_s10 + $0xf8] sm:$0xff] %vm253_vm1, %v1578_v31  ;;  %v1583_v32 = vpop.f32.mrb[15].mxu1 }
 0x10f   : > { %609 = vst.msk [vmem:[%s1392_s10 + $0xf0] sm:$0xff] %vm253_vm1, %v1583_v32  ;;  %v670_v23 = vsel %vm253_vm1, %v1583_v32, 0.0 }
 0x110   : > { %v641_v30 = vadd.f32 %v640_v28, %v639_v27  ;;  %v672_v28 = vsel %vm253_vm1, %v1578_v31, 0.0 }
 0x112   : > { %v643_v34 = vadd.f32 %v642_v29, %v641_v30 }
 0x114   : > { %v645_v41 = vadd.f32 %v644_v36, %v643_v34 }
 0x116   : > { %v647_v43 = vadd.f32 %v646_v37, %v645_v41 }
 0x118   : > { %v649_v49 = vadd.f32 %v648_v44, %v647_v43 }
 0x11a   : > { %v651_v51 = vadd.f32 %v650_v47, %v649_v49 }
 0x11c   : > { %v653_v57 = vadd.f32 %v652_v52, %v651_v51 }
 0x11e   : > { %v655_v59 = vadd.f32 %v654_v55, %v653_v57 }
 0x120   : > { %v657_v1 = vadd.f32 %v656_v60, %v655_v59 }
 0x122   : > { %v659_v3 = vadd.f32 %v658_v63, %v657_v1 }
 0x124   : > { %v661_v9 = vadd.f32 %v660_v4, %v659_v3 }
 0x126   : > { %v663_v11 = vadd.f32 %v662_v7, %v661_v9 }
 0x128   : > { %v665_v17 = vadd.f32 %v664_v12, %v663_v11 }
 0x12a   : > { %v667_v19 = vadd.f32 %v666_v15, %v665_v17 }
 0x12c   : > { %v669_v25 = vadd.f32 %v668_v20, %v667_v19 }
 0x12e   : > { %v671_v27 = vadd.f32 %v670_v23, %v669_v25 }
 0x130   : > { %v673_v29 = vadd.f32 %v672_v28, %v671_v27 }
 0x132   : > { %v674_v30 = vrot.slane %v673_v29, 4 }
 0x134   : > { %v675_v34 = vadd.f32 %v674_v30, %v673_v29 }
 0x136   : > { %v676_v36 = vrot.slane %v675_v34, 2 }
 0x138   : > { %v677_v37 = vadd.f32 %v676_v36, %v675_v34 }
 0x13a   : > { %v678_v41 = vrot.slane %v677_v37, 1 }
 0x13c   : > { %v679_v43 = vadd.f32 %v678_v41, %v677_v37 }
 0x13e   : > { %v680_v44 = vmul.f32 0.00390625, %v679_v43  ;;  %714 = vst.msk [vmem:[%s201_s13] sm:$0x1] %vm713_vm2, %v679_v43 }
 0x13f   : > { %1151 = shalt.err (!%p1148_p3)
}
 0x140   : > { %s1152_s6 = scalar_lea.hbm %s1628_s23, 16  ;;  %s1156_s9 = scalar_lea.hbm %s1828_s3, 32 }
 0x141   : > { %p1153_p4 = scmp.ne.s32.totalorder %s1628_s23, %s1152_s6  ;;  %p1157_p9 = scmp.lt.u32.totalorder %s1628_s23, %s1828_s3 }
 0x142   : > { %p1158_p10 = scmp.lt.u32.totalorder %s1156_s9, %s1152_s6  ;;  %p1160_p12 = scmp.lt.u32.totalorder %s1152_s6, %s1628_s23 }
 0x143   : > { %p1154_p7 = pnand %p1153_p4, %p1299_p5 }
 0x144   : > { %p1159_p11 = por %p1158_p10, %p1157_p9 }
 0x145   : > { %p1155_p8 = pneg %p1154_p7 }
 0x146   : > { %p1161_p13 = por %p1160_p12, %p1159_p11 }
 0x148   : > { %p1162_p0 = pnand %p1161_p13, %p1155_p8 }
 0x14a   : > { %1165 = shalt.err (!%p1162_p0)
}
 0x14b   : > { %1094 = dma.vmem_to_hbm [thread:$0]  (%p1299_p5), %s1630_s14, 16, %s1628_s23, %s823_s27   ;;  %v681_v47 = vsub.f32 %v1401_v35, %v680_v44  ;;  %v682_v49 = vsub.f32 %v1394_v33, %v680_v44  ;;  %v683_v51 = vsub.f32 %v1413_v39, %v680_v44  ;;  %v684_v52 = vsub.f32 %v1408_v38, %v680_v44 }
 0x14c   : > { %v685_v55 = vsub.f32 %v1437_v46, %v680_v44  ;;  %v686_v57 = vsub.f32 %v1432_v45, %v680_v44  ;;  %v687_v59 = vsub.f32 %v1461_v54, %v680_v44  ;;  %v688_v60 = vsub.f32 %v1456_v53, %v680_v44  ;;  %s207_s14 = scalar_lea.vmem [#allocation4], %s1619_s11  ;;  %s1781_s27 = scalar_lea.hbm %s1829_s4, %s1005_s12 }
 0x14d   : > { %v689_v63 = vsub.f32 %v1485_v62, %v680_v44  ;;  %v690_v1 = vsub.f32 %v1480_v61, %v680_v44  ;;  %v691_v35 = vsub.f32 %v1509_v6, %v680_v44  ;;  %v692_v33 = vsub.f32 %v1504_v5, %v680_v44  ;;  %s856_s20 = sshll.u32 %s207_s14, 4  ;;  %s827_s28 = scalar_lea.sflag [#allocation5], %s1619_s11  ;;  %s1783_s20 = int_to_ptr.vmem [resolvable:$true] %s856_s20 }
 0x14e   : > { %v693_v39 = vsub.f32 %v1533_v14, %v680_v44  ;;  %v694_v38 = vsub.f32 %v1528_v13, %v680_v44  ;;  %v695_v46 = vsub.f32 %v1557_v22, %v680_v44  ;;  %v696_v45 = vsub.f32 %v1552_v21, %v680_v44  ;;  %s1166_s29 = scalar_lea.vmem %s1783_s20, 16  ;;  %s1235_s30 = smov [#allocation4]  }
 0x14f   : > { %v697_v54 = vsub.f32 %v1425_v42, %v680_v44  ;;  %v698_v53 = vsub.f32 %v1415_v40, %v680_v44  ;;  %v1674_v62 = vsub.f32 %v1449_v50, %v680_v44  ;;  %v1677_v61 = vsub.f32 %v1439_v48, %v680_v44  ;;  %p1167_p1 = scmp.ne.s32.totalorder %s1783_s20, %s1166_s29  ;;  %s1170_s19 = sshll.u32 %s1235_s30, 4  ;;  %s1171_s19 = int_to_ptr.vmem [resolvable:$false] %s1170_s19 }
 0x150   : > { %v1680_v5 = vsub.f32 %v1473_v58, %v680_v44  ;;  %v1683_v6 = vsub.f32 %v1463_v56, %v680_v44  ;;  %v1686_v13 = vsub.f32 %v1497_v2, %v680_v44  ;;  %v1689_v14 = vsub.f32 %v1487_v0, %v680_v44  ;;  %s1172_s5 = scalar_lea.vmem %s1171_s19, 32  ;;  %p1173_p4 = scmp.lt.s32.totalorder %s1783_s20, %s1171_s19 }
 0x151   : > { %v1692_v40 = vsub.f32 %v1521_v10, %v680_v44  ;;  %v1695_v42 = vsub.f32 %v1511_v8, %v680_v44  ;;  %v1698_v48 = vsub.f32 %v1545_v18, %v680_v44  ;;  %v1701_v50 = vsub.f32 %v1535_v16, %v680_v44  ;;  %p1168_p2 = pnand %p1167_p1, %p1299_p5  ;;  %p1174_p7 = scmp.lt.s32.totalorder %s1172_s5, %s1166_s29 }
 0x152   : > { %v1704_v56 = vsub.f32 %v1569_v26, %v680_v44  ;;  %v1707_v58 = vsub.f32 %v1559_v24, %v680_v44  ;;  %v1710_v0 = vsub.f32 %v1583_v32, %v680_v44  ;;  %v1713_v2 = vsub.f32 %v1578_v31, %v680_v44 }
 0x153   : > { %v715_v8 = vmul.f32 %v681_v47, %v681_v47  ;;  %v716_v10 = vmul.f32 %v682_v49, %v682_v49  ;;  %v717_v21 = vmul.f32 %v683_v51, %v683_v51  ;;  %v718_v18 = vmul.f32 %v684_v52, %v684_v52  ;;  %p1169_p3 = pneg %p1168_p2  ;;  %p1175_p8 = por %p1174_p7, %p1173_p4 }
 0x154   : > { %v719_v26 = vmul.f32 %v685_v55, %v685_v55  ;;  %v720_v7 = vmul.f32 %v686_v57, %v686_v57  ;;  %v721_v11 = vmul.f32 %v687_v59, %v687_v59  ;;  %v722_v15 = vmul.f32 %v688_v60, %v688_v60 }
 0x155   : > { %v747_v22 = vsel %vm253_vm1, %v715_v8, 0.0  ;;  %v748_v16 = vsel %vm253_vm1, %v716_v10, 0.0  ;;  %v750_v4 = vsel %vm253_vm1, %v717_v21, 0.0  ;;  %v752_v32 = vsel %vm253_vm1, %v718_v18, 0.0  ;;  %p1176_p9 = pnand %p1175_p8, %p1169_p3 }
 0x156   : > { %v749_v3 = vadd.f32 %v748_v16, %v747_v22  ;;  %v754_v31 = vsel %vm253_vm1, %v719_v26, 0.0  ;;  %v756_v17 = vsel %vm253_vm1, %v720_v7, 0.0  ;;  %v723_v20 = vmul.f32 %v689_v63, %v689_v63 }
 0x157   : > { %v758_v23 = vsel %vm253_vm1, %v721_v11, 0.0  ;;  %v724_v27 = vmul.f32 %v690_v1, %v690_v1  ;;  %v760_v28 = vsel %vm253_vm1, %v722_v15, 0.0  ;;  %v725_v30 = vmul.f32 %v691_v35, %v691_v35 }
 0x158   : > { %v751_v24 = vadd.f32 %v750_v4, %v749_v3  ;;  %v762_v34 = vsel %vm253_vm1, %v723_v20, 0.0  ;;  %v726_v37 = vmul.f32 %v692_v33, %v692_v33  ;;  %v727_v44 = vmul.f32 %v693_v39, %v693_v39 }
 0x159   : > { %v764_v41 = vsel %vm253_vm1, %v724_v27, 0.0  ;;  %v766_v47 = vsel %vm253_vm1, %v725_v30, 0.0  ;;  %v728_v51 = vmul.f32 %v694_v38, %v694_v38  ;;  %v729_v57 = vmul.f32 %v695_v46, %v695_v46 }
 0x15a   : > { %v753_v9 = vadd.f32 %v752_v32, %v751_v24  ;;  %v768_v52 = vsel %vm253_vm1, %v726_v37, 0.0  ;;  %v770_v59 = vsel %vm253_vm1, %v727_v44, 0.0  ;;  %v730_v63 = vmul.f32 %v696_v45, %v696_v45 }
 0x15b   : > { %v772_v1 = vsel %vm253_vm1, %v728_v51, 0.0  ;;  %v731_v33 = vmul.f32 %v697_v54, %v697_v54  ;;  %v774_v8 = vsel %vm253_vm1, %v729_v57, 0.0  ;;  %v732_v39 = vmul.f32 %v698_v53, %v698_v53 }
 0x15c   : > { %v755_v12 = vadd.f32 %v754_v31, %v753_v9  ;;  %v776_v21 = vsel %vm253_vm1, %v730_v63, 0.0  ;;  %v733_v38 = vmul.f32 %v1674_v62, %v1674_v62  ;;  %v734_v45 = vmul.f32 %v1677_v61, %v1677_v61 }
 0x15d   : > { %v778_v46 = vsel %vm253_vm1, %v731_v33, 0.0  ;;  %v780_v16 = vsel %vm253_vm1, %v732_v39, 0.0  ;;  %v735_v54 = vmul.f32 %v1680_v5, %v1680_v5  ;;  %v736_v4 = vmul.f32 %v1683_v6, %v1683_v6 }
 0x15e   : > { %v757_v19 = vadd.f32 %v756_v17, %v755_v12  ;;  %v782_v53 = vsel %vm253_vm1, %v733_v38, 0.0  ;;  %v784_v62 = vsel %vm253_vm1, %v734_v45, 0.0  ;;  %v737_v7 = vmul.f32 %v1686_v13, %v1686_v13 }
 0x15f   : > { %v786_v61 = vsel %vm253_vm1, %v735_v54, 0.0  ;;  %v738_v9 = vmul.f32 %v1689_v14, %v1689_v14  ;;  %v788_v5 = vsel %vm253_vm1, %v736_v4, 0.0  ;;  %v739_v31 = vmul.f32 %v1692_v40, %v1692_v40 }
 0x160   : > { %v759_v25 = vadd.f32 %v758_v23, %v757_v19  ;;  %v790_v6 = vsel %vm253_vm1, %v737_v7, 0.0  ;;  %v740_v15 = vmul.f32 %v1695_v42, %v1695_v42  ;;  %v741_v19 = vmul.f32 %v1698_v48, %v1698_v48 }
 0x161   : > { %v792_v13 = vsel %vm253_vm1, %v738_v9, 0.0  ;;  %v794_v14 = vsel %vm253_vm1, %v739_v31, 0.0  ;;  %v742_v23 = vmul.f32 %v1701_v50, %v1701_v50  ;;  %v743_v27 = vmul.f32 %v1704_v56, %v1704_v56 }
 0x162   : > { %v761_v29 = vadd.f32 %v760_v28, %v759_v25  ;;  %v796_v40 = vsel %vm253_vm1, %v740_v15, 0.0  ;;  %v798_v42 = vsel %vm253_vm1, %v741_v19, 0.0  ;;  %v746_v56 = vmul.f32 %v1713_v2, %v1713_v2 }
 0x163   : > { %v800_v48 = vsel %vm253_vm1, %v742_v23, 0.0  ;;  %v802_v50 = vsel %vm253_vm1, %v743_v27, 0.0 }
 0x164   : > { %v763_v36 = vadd.f32 %v762_v34, %v761_v29  ;;  %v744_v29 = vmul.f32 %v1707_v58, %v1707_v58  ;;  %v745_v34 = vmul.f32 %v1710_v0, %v1710_v0  ;;  %v808_v44 = vsel %vm253_vm1, %v746_v56, 0.0 }
 0x166   : > { %v765_v43 = vadd.f32 %v764_v41, %v763_v36  ;;  %v804_v37 = vsel %vm253_vm1, %v744_v29, 0.0  ;;  %v806_v58 = vsel %vm253_vm1, %v745_v34, 0.0 }
 0x168   : > { %v767_v49 = vadd.f32 %v766_v47, %v765_v43 }
 0x16a   : > { %v769_v55 = vadd.f32 %v768_v52, %v767_v49 }
 0x16c   : > { %v771_v60 = vadd.f32 %v770_v59, %v769_v55 }
 0x16e   : > { %v773_v35 = vadd.f32 %v772_v1, %v771_v60 }
 0x170   : > { %v775_v10 = vadd.f32 %v774_v8, %v773_v35 }
 0x172   : > { %v777_v18 = vadd.f32 %v776_v21, %v775_v10 }
 0x174   : > { %v779_v22 = vadd.f32 %v778_v46, %v777_v18 }
 0x176   : > { %v781_v3 = vadd.f32 %v780_v16, %v779_v22 }
 0x178   : > { %v783_v26 = vadd.f32 %v782_v53, %v781_v3 }
 0x17a   : > { %v785_v24 = vadd.f32 %v784_v62, %v783_v26 }
 0x17c   : > { %v787_v32 = vadd.f32 %v786_v61, %v785_v24 }
 0x17e   : > { %v789_v11 = vadd.f32 %v788_v5, %v787_v32 }
 0x180   : > { %v791_v12 = vadd.f32 %v790_v6, %v789_v11 }
 0x182   : > { %v793_v17 = vadd.f32 %v792_v13, %v791_v12 }
 0x184   : > { %v795_v20 = vadd.f32 %v794_v14, %v793_v17 }
 0x186   : > { %v797_v25 = vadd.f32 %v796_v40, %v795_v20 }
 0x188   : > { %v799_v28 = vadd.f32 %v798_v42, %v797_v25 }
 0x18a   : > { %v801_v30 = vadd.f32 %v800_v48, %v799_v28 }
 0x18c   : > { %v803_v36 = vadd.f32 %v802_v50, %v801_v30 }
 0x18e   : > { %v805_v41 = vadd.f32 %v804_v37, %v803_v36 }
 0x190   : > { %v807_v43 = vadd.f32 %v806_v58, %v805_v41 }
 0x192   : > { %v809_v47 = vadd.f32 %v808_v44, %v807_v43 }
 0x194   : > { %v810_v49 = vrot.slane %v809_v47, 4 }
 0x196   : > { %v811_v0 = vadd.f32 %v810_v49, %v809_v47 }
 0x198   : > { %v812_v51 = vrot.slane %v811_v0, 2 }
 0x19a   : > { %v813_v52 = vadd.f32 %v812_v51, %v811_v0 }
 0x19c   : > { %v814_v55 = vrot.slane %v813_v52, 1 }
 0x19e   : > { %v815_v57 = vadd.f32 %v814_v55, %v813_v52 }
 0x1a0   : > { %816 = vst.msk [vmem:[%s207_s14] sm:$0x1] %vm713_vm2, %v815_v57 }
 0x1a1   : > { %1179 = shalt.err (!%p1176_p9)
}
 0x1a2   : > { %s1180_s11 = scalar_lea.hbm %s1781_s27, 16  ;;  %s1184_s7 = scalar_lea.hbm %s1829_s4, 32 }
 0x1a3   : > { %p1181_p10 = scmp.ne.s32.totalorder %s1781_s27, %s1180_s11  ;;  %p1185_p13 = scmp.lt.u32.totalorder %s1781_s27, %s1829_s4 }
 0x1a4   : > { %p1186_p0 = scmp.lt.u32.totalorder %s1184_s7, %s1180_s11  ;;  %p1188_p2 = scmp.lt.u32.totalorder %s1180_s11, %s1781_s27 }
 0x1a5   : > { %p1182_p11 = pnand %p1181_p10, %p1299_p5 }
 0x1a6   : > { %p1187_p1 = por %p1186_p0, %p1185_p13 }
 0x1a7   : > { %p1183_p12 = pneg %p1182_p11 }
 0x1a8   : > { %p1189_p3 = por %p1188_p2, %p1187_p1 }
 0x1aa   : > { %p1190_p4 = pnand %p1189_p3, %p1183_p12 }
 0x1ac   : > { %1193 = shalt.err (!%p1190_p4)
}
 0x1ad   : > { %1095 = dma.vmem_to_hbm [thread:$0]  (%p1299_p5), %s1783_s20, 16, %s1781_s27, %s827_s28  }
 0x1ae PF: > { %p1105_p7 = scmp.ge.s32.totalorder %s1232_s18, 2  ;;  %s876_s10 = sand.u32 1, %s1220_s15  }
 0x1af   : > { %s877_s13 = scalar_lea.sflag [#allocation3], %s876_s10 }
 0x1b0   : > { %p1099_p8 = pnand %p1105_p7, %p1303_p6 }
 0x1b2   : > { %1211 = dma.done.wait (!%p1099_p8), %s877_s13, 16  }
 0x1b3   : > { %1213 = vsyncadd (!%p1099_p8), %s877_s13, 4294967280  ;;  %s885_s14 = scalar_lea.sflag [#allocation5], %s876_s10 }
 0x1b4   : > { %1215 = dma.done.wait (!%p1099_p8), %s885_s14, 16  }
 0x1b5   : > { %1217 = vsyncadd (!%p1099_p8), %s885_s14, 4294967280  ;;  %p18_p5 = scmp.ge.s32.totalorder %s1286_s21, 4   ;;  %s1832_s15 = smov %s1224_s16 }
 0x1b6   : > { %s1833_s16 = smov %s1228_s17  ;;  %s1834_s17 = smov %s1297_s24 }
 0x1b7   : > { %s1835_s18 = smov %s1286_s21  ;;  %20 = sbr.rel (!%p18_p5) target bundleno = 5 (0x5), region = 92 }
 0x1be   :  { %889 = vsyncpa [#allocation3], 1 }
 0x1bf   :  { %891 = vsyncpa [#allocation3 + $0x1], 1 }
 0x1c0   :  { %892 = vsyncpa [#allocation5], 1 }
 0x1c1   :  { %894 = vsyncpa [#allocation5 + $0x1], 1 }

</bundles_post_ra>
